<compile_context>
chip_gen: v6e
topology: v6e:2x2x1
jax: 0.10.0
libtpu: 0.0.40
codegen_flags: <defaults>
</compile_context>

<pallas_src>
import functools

import jax
import jax.numpy as jnp
import numpy as np
from jax.experimental import pallas as pl
from jax.experimental.pallas import tpu as pltpu

LEAKY_SLOPE = 0.01  # nn.LeakyReLU() default negative_slope


def _leaky(y):
    return jnp.where(y > 0, y, LEAKY_SLOPE * y)


# ----------------------------------------------------------------------------
# Fused Pallas kernel.  grid = (B, H // TH); one step = one batch x one row tile.
# ----------------------------------------------------------------------------
def _cssa_kernel(slab_ref, col_msi_ref, col_hsi_ref, w_m_ref, w_h_ref,
                 w_a_ref, b_a_ref, out_ref, p_scr, *, W, TILE):
    t = pl.program_id(1)

    # ---- small path: both down-convs + simi + softmax, once per batch ------
    @pl.when(t == 0)
    def _():
        # MSI_down_conv -> HRMSI_feature (c_pad, Nm); bias folded via ones column.
        msi = _leaky(jax.lax.dot_general(
            w_m_ref[...], col_msi_ref[...], (((1,), (1,)), ((), ())),
            preferred_element_type=jnp.float32))                        # (8, Nm)
        # HSI_down_conv -> LRHSI_feature in (Nh, C) orientation.
        hsiT = _leaky(jax.lax.dot_general(
            col_hsi_ref[...], w_h_ref[...], (((1,), (1,)), ((), ())),
            preferred_element_type=jnp.float32))                        # (Nh, C)
        # simi kept in f32 (tiny matmul; preserves softmax-logit accuracy).
        simi = jnp.dot(msi, hsiT, preferred_element_type=jnp.float32)   # (8, C)
        m = jnp.max(simi, axis=-1, keepdims=True)
        e = jnp.exp(simi - m)
        p = e * pl.reciprocal(jnp.sum(e, axis=-1, keepdims=True), approx=True)
        p_scr[...] = p.astype(jnp.bfloat16)                             # (8, C)

    # ---- align_conv on this row tile (in-kernel im2col) --------------------
    # slab rows = (Cin, dj); the three kh shifts are lane-offset windows of the
    # flattened, vertically-padded image, so the conv is 3 small MXU matmuls.
    slab = slab_ref[...]                                                # (9, (TH+2)*W) bf16
    wa = w_a_ref[...]                                                   # (3, 8, 9)     bf16
    acc = jnp.dot(wa[0], slab[:, 0:TILE], preferred_element_type=jnp.float32)
    acc += jnp.dot(wa[1], slab[:, W:W + TILE], preferred_element_type=jnp.float32)
    acc += jnp.dot(wa[2], slab[:, 2 * W:2 * W + TILE], preferred_element_type=jnp.float32)
    align = _leaky(acc + b_a_ref[...])                                  # (8, TILE) f32

    # out_tile = simi^T @ align (contract the small spectral dim of both; bf16 MXU).
    out_ref[...] = jax.lax.dot_general(
        p_scr[...], align.astype(jnp.bfloat16), (((0,), (0,)), ((), ())),
        preferred_element_type=jnp.float32)                             # (C, TILE)


# ----------------------------------------------------------------------------
# XLA glue (all small)
# ----------------------------------------------------------------------------
def _im2col_nk(x, kh, kw, stride, padding):
    """NCHW im2col, transposed: (B, Ho*Wo, Cin*kh*kw); K ordered (Cin, kh, kw)."""
    B, Cin, H, W = x.shape
    xp = jnp.pad(x, ((0, 0), (0, 0), (padding, padding), (padding, padding)))
    Hp, Wp = H + 2 * padding, W + 2 * padding
    Ho = (Hp - kh) // stride + 1
    Wo = (Wp - kw) // stride + 1
    cols = []
    for i in range(kh):
        for j in range(kw):
            cols.append(xp[:, :, i:i + stride * Ho:stride, j:j + stride * Wo:stride])
    col = jnp.stack(cols, axis=2)                        # (B, Cin, kh*kw, Ho, Wo)
    col = col.reshape(B, Cin * kh * kw, Ho * Wo)
    return col.transpose(0, 2, 1), Ho, Wo                # (B, N, K) — K lane-dense


def _augment_ones(col):
    """Append a ones column so the conv bias folds into the matmul."""
    B, N, _ = col.shape
    return jnp.concatenate([col, jnp.ones((B, N, 1), col.dtype)], axis=-1)


def _align_slabs(hrmsi_bf16, th):
    """Halo'd, dj-expanded row-tile slabs for the 3x3 / s1 / p1 align conv.

    Returns (B, T, Cin*3, (th+2)*W); row index = ci*3 + dj, lane axis = flattened
    (row, col) of the vertically padded image, so the kh shifts inside the kernel
    are lane-offset windows of size th*W.
    """
    B, c, H, W = hrmsi_bf16.shape
    xp = jnp.pad(hrmsi_bf16, ((0, 0), (0, 0), (1, 1), (1, 1)))               # (B,c,H+2,W+2)
    s = jnp.stack([xp[:, :, :, dj:dj + W] for dj in range(3)], axis=2)       # (B,c,3,H+2,W)
    sf = s.reshape(B, c * 3, (H + 2) * W)
    T = H // th
    slabs = jnp.stack(
        [sf[:, :, t * th * W:(t * th + th + 2) * W] for t in range(T)], axis=1)
    return slabs, T                                                          # (B,T,9,(th+2)*W)


def cross_spectral_scale_attention_block(LRHSI, HRMSI, params, ratio=4, tile_rows=16):
    """Forward pass of CrossSpectralScaleAttentionBlock (one fused kernel)."""
    B, C, h, w = LRHSI.shape
    _, c, H, W = HRMSI.shape
    HW = H * W
    cp = 8                                   # align / MSI channels padded to a sublane group
    TH = tile_rows if H % tile_rows == 0 else H
    TILE = TH * W
    assert TILE % 128 == 0, "row-tile width must be lane-aligned"
    bf16 = jnp.bfloat16

    # Align path: bf16 dj-expanded halo'd slabs (no 9x im2col in HBM).
    slabs, T = _align_slabs(HRMSI.astype(bf16), TH)                     # (B,T,9,(TH+2)*W)
    slab_w = (TH + 2) * W

    # Down-conv paths: tiny transposed im2cols, bias folded via ones column.
    # TODO(synk): these two strided 5x5 im2cols remain XLA glue (<60 KB total).
    col_hsi, hh, ww = _im2col_nk(LRHSI, 5, 5, stride=4, padding=1)      # (B, Nh, 775)
    col_msi, Hm, Wm = _im2col_nk(HRMSI, 5, 5, stride=4 * ratio, padding=0)
    Nh, Nm = hh * ww, Hm * Wm
    col_hsi = _augment_ones(col_hsi).astype(bf16)                       # (B, Nh, Kh1)
    col_msi = _augment_ones(col_msi).astype(bf16)                       # (B, Nm, Km1)
    Kh1, Km1 = C * 25 + 1, c * 25 + 1

    # Weights: bias as last column; MSI/align C_out padded 3 -> 8 with zero rows.
    w_h = jnp.concatenate([params["hsi_w"].reshape(C, C * 25),
                           params["hsi_b"][:, None]], axis=1).astype(bf16)        # (C, Kh1)
    w_m = jnp.concatenate([params["msi_w"].reshape(c, c * 25),
                           params["msi_b"][:, None]], axis=1)
    w_m = jnp.pad(w_m, ((0, cp - c), (0, 0))).astype(bf16)                         # (cp, Km1)
    # Align weight regrouped per kh shift: w_a[di, co, ci*3 + dj].
    w_a = params["align_w"].transpose(2, 0, 1, 3).reshape(3, c, c * 3)
    w_a = jnp.pad(w_a, ((0, 0), (0, cp - c), (0, 0))).astype(bf16)                 # (3, cp, 9)
    b_a = jnp.pad(params["align_b"], (0, cp - c)).reshape(cp, 1).astype(jnp.float32)

    kern = functools.partial(_cssa_kernel, W=W, TILE=TILE)

    out = pl.pallas_call(
        kern,
        out_shape=jax.ShapeDtypeStruct((B, C, HW), jnp.float32),
        grid_spec=pltpu.PrefetchScalarGridSpec(
            num_scalar_prefetch=0,
            grid=(B, T),
            in_specs=[
                pl.BlockSpec((None, None, 3 * c, slab_w), lambda b, t: (b, t, 0, 0)),
                pl.BlockSpec((None, Nm, Km1), lambda b, t: (b, 0, 0)),   # col_msi
                pl.BlockSpec((None, Nh, Kh1), lambda b, t: (b, 0, 0)),   # col_hsi
                pl.BlockSpec((cp, Km1), lambda b, t: (0, 0)),            # w_m (+bias)
                pl.BlockSpec((C, Kh1), lambda b, t: (0, 0)),             # w_h (+bias)
                pl.BlockSpec((3, cp, 3 * c), lambda b, t: (0, 0, 0)),    # w_a (per kh)
                pl.BlockSpec((cp, 1), lambda b, t: (0, 0)),              # b_a
            ],
            out_specs=pl.BlockSpec((None, C, TILE), lambda b, t: (b, 0, t)),
            scratch_shapes=[pltpu.VMEM((cp, C), jnp.bfloat16)],          # softmax'd simi
        ),
        compiler_params=pltpu.CompilerParams(
            dimension_semantics=("parallel", "arbitrary")),
    )(slabs, col_msi, col_hsi, w_m, w_h, w_a, b_a)

    return out.reshape(B, C, H, W)   # lane-dense output, only a reshape needed


# ----------------------------------------------------------------------------
# Pure-JAX reference (for correctness check)
# ----------------------------------------------------------------------------
def reference_forward(LRHSI, HRMSI, params, ratio=4):
    def conv(x, wgt, b, stride, pad):
        y = jax.lax.conv_general_dilated(
            x, wgt, window_strides=(stride, stride),
            padding=[(pad, pad), (pad, pad)],
            dimension_numbers=("NCHW", "OIHW", "NCHW"),
            precision=jax.lax.Precision.HIGHEST)
        y = y + b[None, :, None, None]
        return jnp.where(y > 0, y, LEAKY_SLOPE * y)

    B, C, _, _ = LRHSI.shape
    _, c, H, W = HRMSI.shape
    align = conv(HRMSI, params["align_w"], params["align_b"], 1, 1).reshape(B, c, H * W)
    hsi = conv(LRHSI, params["hsi_w"], params["hsi_b"], 4, 1)
    msi = conv(HRMSI, params["msi_w"], params["msi_b"], 4 * ratio, 0)
    hsi = hsi.reshape(B, C, -1).transpose(0, 2, 1)
    msi = msi.reshape(B, c, -1)
    simi = jnp.einsum("bcn,bnC->bcC", msi, hsi, precision=jax.lax.Precision.HIGHEST)
    simi = jax.nn.softmax(simi, axis=-1)
    out = jnp.einsum("bcC,bck->bCk", simi, align, precision=jax.lax.Precision.HIGHEST)
    return out.reshape(B, C, H, W)


# ----------------------------------------------------------------------------
# Main
# ----------------------------------------------------------------------------
if __name__ == "__main__":
    ratio, HSI_bands, MSI_bands = 4, 31, 3
    B, h, w = 2, 16, 16            # LRHSI spatial
    H, W = 64, 64                  # HRMSI spatial (both down-convs yield 4x4 = 16 tokens)

    key = jax.random.PRNGKey(0)
    k = jax.random.split(key, 8)

    LRHSI = jax.random.normal(k[0], (B, HSI_bands, h, w), dtype=jnp.float32)
    HRMSI = jax.random.normal(k[1], (B, MSI_bands, H, W), dtype=jnp.float32)

    params = {
        # MSI_down_conv: Conv2d(3, 3, 5, stride=16)
        "msi_w": 0.05 * jax.random.normal(k[2], (MSI_bands, MSI_bands, 5, 5), jnp.float32),
        "msi_b": 0.01 * jax.random.normal(k[3], (MSI_bands,), jnp.float32),
        # HSI_down_conv: Conv2d(31, 31, 5, stride=4, pad=1)
        "hsi_w": 0.05 * jax.random.normal(k[4], (HSI_bands, HSI_bands, 5, 5), jnp.float32),
        "hsi_b": 0.01 * jax.random.normal(k[5], (HSI_bands,), jnp.float32),
        # align_conv: Conv2d(3, 3, 3, stride=1, pad=1)
        "align_w": 0.05 * jax.random.normal(k[6], (MSI_bands, MSI_bands, 3, 3), jnp.float32),
        "align_b": 0.01 * jax.random.normal(k[7], (MSI_bands,), jnp.float32),
    }

    fwd = jax.jit(lambda a, b, p: cross_spectral_scale_attention_block(a, b, p, ratio=ratio))
    out = jax.block_until_ready(fwd(LRHSI, HRMSI, params))

    ref = jax.block_until_ready(reference_forward(LRHSI, HRMSI, params, ratio=ratio))
    assert out.shape == (B, HSI_bands, H, W), out.shape
    # bf16 MXU operands throughout -> ~3e-2 mixed-precision tolerance vs f32 reference.
    np.testing.assert_allclose(np.asarray(out), np.asarray(ref), rtol=3e-2, atol=3e-2)

    print("KERNEL_OK")
</pallas_src>

<mosaic_0001>
module attributes {stable_mosaic.version = 11 : i64} {
  func.func @_cssa_kernel(%arg0: i32, %arg1: i32, %arg2: memref<1x1x9x1152xbf16, #tpu.memory_space<vmem>>, %arg3: memref<1x16x76xbf16, #tpu.memory_space<vmem>>, %arg4: memref<1x16x776xbf16, #tpu.memory_space<vmem>>, %arg5: memref<8x76xbf16, #tpu.memory_space<vmem>>, %arg6: memref<31x776xbf16, #tpu.memory_space<vmem>>, %arg7: memref<3x8x9xbf16, #tpu.memory_space<vmem>>, %arg8: memref<8x1xf32, #tpu.memory_space<vmem>>, %arg9: memref<1x31x1024xf32, #tpu.memory_space<vmem>>, %arg10: memref<8x31xbf16, #tpu.memory_space<vmem>>) attributes {dimension_semantics = [#tpu.dimension_semantics<parallel>, #tpu.dimension_semantics<arbitrary>], iteration_bounds = array<i64: 2, 4>, scalar_prefetch = 0 : i64, scratch_operands = 1 : i64, tpu.core_type = #tpu.core_type<tc>, window_params = [{transform_indices = @transform_0, window_bounds = array<i64: 1, 1, 9, 1152>}, {transform_indices = @transform_1, window_bounds = array<i64: 1, 16, 76>}, {transform_indices = @transform_2, window_bounds = array<i64: 1, 16, 776>}, {pipeline_mode = #tpu.pipeline_mode<synchronous>, transform_indices = @transform_3, window_bounds = array<i64: 8, 76>}, {pipeline_mode = #tpu.pipeline_mode<synchronous>, transform_indices = @transform_4, window_bounds = array<i64: 31, 776>}, {pipeline_mode = #tpu.pipeline_mode<synchronous>, transform_indices = @transform_5, window_bounds = array<i64: 3, 8, 9>}, {pipeline_mode = #tpu.pipeline_mode<synchronous>, transform_indices = @transform_6, window_bounds = array<i64: 8, 1>}, {transform_indices = @transform_7, window_bounds = array<i64: 1, 31, 1024>}]} {
    %c0_i32 = arith.constant 0 : i32
    %0 = arith.cmpi eq, %arg1, %c0_i32 : i32
    %1 = arith.extui %0 : i1 to i32
    %c0_i32_0 = arith.constant 0 : i32
    %2 = arith.cmpi ne, %1, %c0_i32_0 : i32
    scf.if %2 {
      %c0_19 = arith.constant 0 : index
      %c0_20 = arith.constant 0 : index
      %34 = vector.load %arg5[%c0_19, %c0_20] : memref<8x76xbf16, #tpu.memory_space<vmem>>, vector<8x76xbf16>
      %c0_21 = arith.constant 0 : index
      %c0_22 = arith.constant 0 : index
      %c0_23 = arith.constant 0 : index
      %35 = vector.load %arg3[%c0_21, %c0_22, %c0_23] : memref<1x16x76xbf16, #tpu.memory_space<vmem>>, vector<1x16x76xbf16>
      %36 = vector.shape_cast %35 : vector<1x16x76xbf16> to vector<16x76xbf16>
      %cst_24 = arith.constant dense<0.000000e+00> : vector<8x16xf32>
      %37 = tpu.matmul %34, %36, %cst_24 {dimension_numbers = #tpu.dot_dimension_numbers<[1], [1], [0], [0], [0, 0, 1, 0], [], []>} : vector<8x76xbf16>, vector<16x76xbf16>, vector<8x16xf32> -> vector<8x16xf32>
      %cst_25 = arith.constant 0.000000e+00 : f32
      %38 = vector.broadcast %cst_25 : f32 to vector<8x16xf32>
      %39 = arith.cmpf ogt, %37, %38 : vector<8x16xf32>
      %cst_26 = arith.constant 0.00999999977 : f32
      %40 = vector.broadcast %cst_26 : f32 to vector<8x16xf32>
      %41 = arith.mulf %40, %37 : vector<8x16xf32>
      %42 = arith.select %39, %37, %41 : vector<8x16xi1>, vector<8x16xf32>
      %c0_27 = arith.constant 0 : index
      %c0_28 = arith.constant 0 : index
      %c0_29 = arith.constant 0 : index
      %43 = vector.load %arg4[%c0_27, %c0_28, %c0_29] : memref<1x16x776xbf16, #tpu.memory_space<vmem>>, vector<1x16x776xbf16>
      %44 = vector.shape_cast %43 : vector<1x16x776xbf16> to vector<16x776xbf16>
      %c0_30 = arith.constant 0 : index
      %c0_31 = arith.constant 0 : index
      %45 = vector.load %arg6[%c0_30, %c0_31] : memref<31x776xbf16, #tpu.memory_space<vmem>>, vector<31x776xbf16>
      %cst_32 = arith.constant dense<0.000000e+00> : vector<16x31xf32>
      %46 = tpu.matmul %44, %45, %cst_32 {dimension_numbers = #tpu.dot_dimension_numbers<[1], [1], [0], [0], [0, 0, 1, 0], [], []>} : vector<16x776xbf16>, vector<31x776xbf16>, vector<16x31xf32> -> vector<16x31xf32>
      %cst_33 = arith.constant 0.000000e+00 : f32
      %47 = vector.broadcast %cst_33 : f32 to vector<16x31xf32>
      %48 = arith.cmpf ogt, %46, %47 : vector<16x31xf32>
      %cst_34 = arith.constant 0.00999999977 : f32
      %49 = vector.broadcast %cst_34 : f32 to vector<16x31xf32>
      %50 = arith.mulf %49, %46 : vector<16x31xf32>
      %51 = arith.select %48, %46, %50 : vector<16x31xi1>, vector<16x31xf32>
      %cst_35 = arith.constant dense<0.000000e+00> : vector<8x31xf32>
      %52 = tpu.matmul %42, %51, %cst_35 {dimension_numbers = #tpu.dot_dimension_numbers<[1], [0], [0], [1], [0, 0, 1, 1], [], []>} : vector<8x16xf32>, vector<16x31xf32>, vector<8x31xf32> -> vector<8x31xf32>
      %cst_36 = arith.constant dense<0xFF800000> : vector<8xf32>
      %53 = vector.multi_reduction <maximumf>, %52, %cst_36 [1] : vector<8x31xf32> to vector<8xf32>
      %54 = vector.shape_cast %53 : vector<8xf32> to vector<8x1xf32>
      %55 = vector.broadcast %54 : vector<8x1xf32> to vector<8x31xf32>
      %56 = arith.subf %52, %55 : vector<8x31xf32>
      %57 = math.exp %56 : vector<8x31xf32>
      %cst_37 = arith.constant dense<0.000000e+00> : vector<8xf32>
      %58 = vector.multi_reduction <add>, %57, %cst_37 [1] : vector<8x31xf32> to vector<8xf32>
      %59 = vector.shape_cast %58 : vector<8xf32> to vector<8x1xf32>
      %60 = tpu.reciprocal %59 {approx = true} : vector<8x1xf32> -> vector<8x1xf32>
      %61 = vector.broadcast %60 : vector<8x1xf32> to vector<8x31xf32>
      %62 = arith.mulf %57, %61 : vector<8x31xf32>
      %63 = arith.truncf %62 : vector<8x31xf32> to vector<8x31xbf16>
      %c0_38 = arith.constant 0 : index
      %c0_39 = arith.constant 0 : index
      %64 = vector.load %arg10[%c0_38, %c0_39] : memref<8x31xbf16, #tpu.memory_space<vmem>>, vector<8x31xbf16>
      tpu.vector_store %arg10[%c0_38, %c0_39], %63 {strides = array<i32>} : memref<8x31xbf16, #tpu.memory_space<vmem>>, vector<8x31xbf16>,
    } else {
    }
    %c0 = arith.constant 0 : index
    %c0_1 = arith.constant 0 : index
    %c0_2 = arith.constant 0 : index
    %c0_3 = arith.constant 0 : index
    %3 = vector.load %arg2[%c0, %c0_1, %c0_2, %c0_3] : memref<1x1x9x1152xbf16, #tpu.memory_space<vmem>>, vector<1x1x9x1152xbf16>
    %4 = vector.shape_cast %3 : vector<1x1x9x1152xbf16> to vector<9x1152xbf16>
    %c0_4 = arith.constant 0 : index
    %c0_5 = arith.constant 0 : index
    %c0_6 = arith.constant 0 : index
    %5 = vector.load %arg7[%c0_4, %c0_5, %c0_6] : memref<3x8x9xbf16, #tpu.memory_space<vmem>>, vector<3x8x9xbf16>
    %6 = vector.extract_strided_slice %5 {offsets = [0, 0, 0], sizes = [1, 8, 9], strides = [1, 1, 1]} : vector<3x8x9xbf16> to vector<1x8x9xbf16>
    %7 = vector.shape_cast %6 : vector<1x8x9xbf16> to vector<8x9xbf16>
    %8 = vector.extract_strided_slice %4 {offsets = [0, 0], sizes = [9, 1024], strides = [1, 1]} : vector<9x1152xbf16> to vector<9x1024xbf16>
    %cst = arith.constant dense<0.000000e+00> : vector<8x1024xf32>
    %9 = tpu.matmul %7, %8, %cst {dimension_numbers = #tpu.dot_dimension_numbers<[1], [0], [0], [1], [0, 0, 1, 1], [], []>} : vector<8x9xbf16>, vector<9x1024xbf16>, vector<8x1024xf32> -> vector<8x1024xf32>
    %10 = vector.extract_strided_slice %5 {offsets = [1, 0, 0], sizes = [1, 8, 9], strides = [1, 1, 1]} : vector<3x8x9xbf16> to vector<1x8x9xbf16>
    %11 = vector.shape_cast %10 : vector<1x8x9xbf16> to vector<8x9xbf16>
    %12 = vector.extract_strided_slice %4 {offsets = [0, 64], sizes = [9, 1024], strides = [1, 1]} : vector<9x1152xbf16> to vector<9x1024xbf16>
    %cst_7 = arith.constant dense<0.000000e+00> : vector<8x1024xf32>
    %13 = tpu.matmul %11, %12, %cst_7 {dimension_numbers = #tpu.dot_dimension_numbers<[1], [0], [0], [1], [0, 0, 1, 1], [], []>} : vector<8x9xbf16>, vector<9x1024xbf16>, vector<8x1024xf32> -> vector<8x1024xf32>
    %14 = arith.addf %9, %13 : vector<8x1024xf32>
    %15 = vector.extract_strided_slice %5 {offsets = [2, 0, 0], sizes = [1, 8, 9], strides = [1, 1, 1]} : vector<3x8x9xbf16> to vector<1x8x9xbf16>
    %16 = vector.shape_cast %15 : vector<1x8x9xbf16> to vector<8x9xbf16>
    %17 = vector.extract_strided_slice %4 {offsets = [0, 128], sizes = [9, 1024], strides = [1, 1]} : vector<9x1152xbf16> to vector<9x1024xbf16>
    %cst_8 = arith.constant dense<0.000000e+00> : vector<8x1024xf32>
    %18 = tpu.matmul %16, %17, %cst_8 {dimension_numbers = #tpu.dot_dimension_numbers<[1], [0], [0], [1], [0, 0, 1, 1], [], []>} : vector<8x9xbf16>, vector<9x1024xbf16>, vector<8x1024xf32> -> vector<8x1024xf32>
    %19 = arith.addf %14, %18 : vector<8x1024xf32>
    %c0_9 = arith.constant 0 : index
    %c0_10 = arith.constant 0 : index
    %20 = vector.load %arg8[%c0_9, %c0_10] : memref<8x1xf32, #tpu.memory_space<vmem>>, vector<8x1xf32>
    %21 = vector.broadcast %20 : vector<8x1xf32> to vector<8x1024xf32>
    %22 = arith.addf %19, %21 : vector<8x1024xf32>
    %cst_11 = arith.constant 0.000000e+00 : f32
    %23 = vector.broadcast %cst_11 : f32 to vector<8x1024xf32>
    %24 = arith.cmpf ogt, %22, %23 : vector<8x1024xf32>
    %cst_12 = arith.constant 0.00999999977 : f32
    %25 = vector.broadcast %cst_12 : f32 to vector<8x1024xf32>
    %26 = arith.mulf %25, %22 : vector<8x1024xf32>
    %27 = arith.select %24, %22, %26 : vector<8x1024xi1>, vector<8x1024xf32>
    %c0_13 = arith.constant 0 : index
    %c0_14 = arith.constant 0 : index
    %28 = vector.load %arg10[%c0_13, %c0_14] : memref<8x31xbf16, #tpu.memory_space<vmem>>, vector<8x31xbf16>
    %29 = arith.truncf %27 : vector<8x1024xf32> to vector<8x1024xbf16>
    %cst_15 = arith.constant dense<0.000000e+00> : vector<31x1024xf32>
    %30 = tpu.matmul %28, %29, %cst_15 {dimension_numbers = #tpu.dot_dimension_numbers<[0], [0], [1], [1], [0, 1, 1, 1], [], []>} : vector<8x31xbf16>, vector<8x1024xbf16>, vector<31x1024xf32> -> vector<31x1024xf32>
    %c0_16 = arith.constant 0 : index
    %c0_17 = arith.constant 0 : index
    %c0_18 = arith.constant 0 : index
    %31 = vector.load %arg9[%c0_16, %c0_17, %c0_18] : memref<1x31x1024xf32, #tpu.memory_space<vmem>>, vector<1x31x1024xf32>
    %32 = vector.shape_cast %31 : vector<1x31x1024xf32> to vector<31x1024xf32>
    %33 = vector.shape_cast %30 : vector<31x1024xf32> to vector<1x31x1024xf32>
    tpu.vector_store %arg9[%c0_16, %c0_17, %c0_18], %33 {strides = array<i32>} : memref<1x31x1024xf32, #tpu.memory_space<vmem>>, vector<1x31x1024xf32>,
    return
  }
  func.func @transform_0(%arg0: i32, %arg1: i32) -> (i32, i32, i32, i32) {
    %c0_i32 = arith.constant 0 : i32
    %c0_i32_0 = arith.constant 0 : i32
    %c0_i32_1 = arith.constant 0 : i32
    return %arg0, %arg1, %c0_i32, %c0_i32_0 : i32, i32, i32, i32
  }
  func.func @transform_1(%arg0: i32, %arg1: i32) -> (i32, i32, i32) {
    %c0_i32 = arith.constant 0 : i32
    %c0_i32_0 = arith.constant 0 : i32
    %c0_i32_1 = arith.constant 0 : i32
    return %arg0, %c0_i32, %c0_i32_0 : i32, i32, i32
  }
  func.func @transform_2(%arg0: i32, %arg1: i32) -> (i32, i32, i32) {
    %c0_i32 = arith.constant 0 : i32
    %c0_i32_0 = arith.constant 0 : i32
    %c0_i32_1 = arith.constant 0 : i32
    return %arg0, %c0_i32, %c0_i32_0 : i32, i32, i32
  }
  func.func @transform_3(%arg0: i32, %arg1: i32) -> (i32, i32) {
    %c0_i32 = arith.constant 0 : i32
    %c0_i32_0 = arith.constant 0 : i32
    %c0_i32_1 = arith.constant 0 : i32
    return %c0_i32, %c0_i32_0 : i32, i32
  }
  func.func @transform_4(%arg0: i32, %arg1: i32) -> (i32, i32) {
    %c0_i32 = arith.constant 0 : i32
    %c0_i32_0 = arith.constant 0 : i32
    %c0_i32_1 = arith.constant 0 : i32
    return %c0_i32, %c0_i32_0 : i32, i32
  }
  func.func @transform_5(%arg0: i32, %arg1: i32) -> (i32, i32, i32) {
    %c0_i32 = arith.constant 0 : i32
    %c0_i32_0 = arith.constant 0 : i32
    %c0_i32_1 = arith.constant 0 : i32
    %c0_i32_2 = arith.constant 0 : i32
    return %c0_i32, %c0_i32_0, %c0_i32_1 : i32, i32, i32
  }
  func.func @transform_6(%arg0: i32, %arg1: i32) -> (i32, i32) {
    %c0_i32 = arith.constant 0 : i32
    %c0_i32_0 = arith.constant 0 : i32
    %c0_i32_1 = arith.constant 0 : i32
    return %c0_i32, %c0_i32_0 : i32, i32
  }
  func.func @transform_7(%arg0: i32, %arg1: i32) -> (i32, i32, i32) {
    %c0_i32 = arith.constant 0 : i32
    %c0_i32_0 = arith.constant 0 : i32
    return %arg0, %c0_i32, %arg1 : i32, i32, i32
  }
}

</mosaic_0001>

<bundles_post_ra>
// kernel: _lambda_.1
= control target key start
LH: loop header
LB: loop body
LE: loop exit
PB: predicated region body
PF: predicated region fallthrough
CT: control target
= control target key end

     0   :  { %s2292_s24 = smov 0   ;;  %s2294_s25 = smov 0   ;;  %s2698_s0 = inlined_call_operand.vmem [shape: bf16[2,4,9,1152], index: 0, kind: input, shape index: {}]   ;;  %s2699_s1 = inlined_call_operand.vmem [shape: bf16[2,16,76], index: 1, kind: input, shape index: {}]   ;;  %s2700_s2 = inlined_call_operand.vmem [shape: bf16[2,16,776], index: 2, kind: input, shape index: {}]   ;;  %s2701_s3 = inlined_call_operand.vmem [shape: bf16[8,76], index: 3, kind: input, shape index: {}]   ;;  %s2702_s4 = inlined_call_operand.vmem [shape: bf16[31,776], index: 4, kind: input, shape index: {}]   ;;  %s2703_s5 = inlined_call_operand.vmem [shape: bf16[3,8,9], index: 5, kind: input, shape index: {}]   ;;  %s2704_s6 = inlined_call_operand.vmem [shape: f32[8,1], index: 6, kind: input, shape index: {}]   ;;  %s2705_s7 = inlined_call_operand.vmem [shape: f32[2,31,4096], index: 7, kind: output, shape index: {}]  }
   0x1   :  { %s2296_s26 = smov 0   ;;  %s2298_s27 = smov 0  }
   0x2   :  { %s2300_s28 = smov 0   ;;  %s2302_s29 = smov 0  }
   0x3   :  { %s2304_s30 = smov 0  }
   0x4 LB: > { %2711 = sst [smem:[#allocation4_spill]] %s2225_s25  ;;  %s26_s8 = sadd.s32 1, %s2237_s28  ;;  %s2245_s30 = sphi %s2304_s30, %s17_s30   ;;  %s2241_s29 = sphi %s2302_s29, %s2723_s29   ;;  %s2237_s28 = sphi %s2300_s28, %s2722_s28   ;;  %s2233_s27 = sphi %s2298_s27, %s2721_s27   ;;  %s2229_s26 = sphi %s2296_s26, %s2720_s26   ;;  %s2225_s25 = sphi %s2294_s25, %s2719_s25   ;;  %s2221_s24 = sphi %s2292_s24, %s2718_s24  }
   0x5   : > { %2712 = sst [smem:[#allocation5_spill]] %s2237_s28  ;;  %p27_p0 = scmp.ge.s32.totalorder %s26_s8, 4 }
   0x6   : > { %2713 = sst [smem:[#allocation6_spill]] %s2241_s29  ;;  %s29_s9 = sadd.s32 1, %s2241_s29 }
   0x7   : > { %s1972_s10 = sadd.s32 4294967295, %s2245_s30   ;;  %p212_p1 = scmp.ne.s32.totalorder %s2225_s25, %s2221_s24 }
   0x8   : > { %s2725_s8 = smov (%p27_p0, %s26_s8), 0  ;;  %s2727_s9 = smov (!%p27_p0, %s29_s9), %s2241_s29 }
   0x9   : > { %2714 = sst [smem:[#allocation7_spill]] %s2725_s8  ;;  %s198_s11 = ssub.s32 %s2237_s28, %s2725_s8 }
   0xa   : > { %p213_p2 = scmp.eq.s32.totalorder %s1972_s10, 7  ;;  %p31_p3 = scmp.ge.s32.totalorder %s2727_s9, 2 }
   0xb   : > { %p1976_p4 = scmp.ge.s32.totalorder %s2245_s30, 1  ;;  %p277_p6 = scmp.lt.s32.totalorder %s2245_s30, 9 }
   0xc   : > { %p2338_p5 = por %p213_p2, %p212_p1  ;;  %s2729_s9 = smov (%p31_p3, %s2727_s9), 0 }
   0xd   : > { %2716 = sst [smem:[#allocation8_spill]] %s2729_s9  ;;  %p278_p7 = pnand %p1976_p4, %p277_p6 }
   0xe   : > { %s197_s13 = ssub.s32 %s2241_s29, %s2729_s9  ;;  %s202_s15 = sadd.s32 1, %s2225_s25 }
   0xf   : > { %s199_s14 = sor.u32 %s198_s11, %s197_s13  ;;  %s319_s17 = sand.u32 (!%p278_p7), 1, %s2221_s24  }
  0x10   : > { %p200_p8 = scmp.eq.s32.totalorder %s199_s14, 0  ;;  %281 = sbr.rel (%p278_p7) target bundleno = 1389 (0x56d), region = 48 }
  0x11   : > { %p322_p9 = scmp.lt.s32.totalorder (!%p278_p7), %s2233_s27, 1  ;;  %s1977_s18 = sshll.u32 (!%p278_p7), %s319_s17, 8 }
  0x12   : > { %s2349_s16 = scalar_select %p200_p8, %s2225_s25, %s202_s15  }
  0x13   : > { %p324_p10 = scmp.lt.s32.totalorder (!%p278_p7), %s2229_s26, 3  ;;  %s2369_s25 = scalar_lea.vmem (!%p278_p7), [#allocation3], %s1977_s18 }
  0x14   : > { %2717 = sst [smem:[#allocation9_spill]] %s2349_s16  ;;  %p1982_p11 = scmp.ne.s32.totalorder (!%p278_p7), %s2229_s26, 0 }
  0x15   : > { %s323_s19 = scalar_select %p322_p9, %s2233_s27, 1 }
  0x16   : > { %s325_s20 = scalar_select %p324_p10, %s2229_s26, 3 }
  0x17   : > { %s2078_s21 = smul.u32 72, %s323_s19  ;;  %s2047_s22 = sshll.u32 %s323_s19, 3 }
  0x18   : > { %s2077_s23 = smul.u32 18, %s325_s20  ;;  %s335_s13 = scalar_lea.vmem %s2699_s1, %s2047_s22 }
  0x19   : > { %s2079_s14 = smul.u32 56, %s323_s19 }
  0x1a   : > { %s328_s15 = sadd.s32 %s2078_s21, %s2077_s23  ;;  %346 = sbr.rel (%p1982_p11) target bundleno = 785 (0x311), region = 52 }
  0x1b   : > { %s1978_s9 = sshll.u32 %s328_s15, 2  ;;  %s2362_s28 = scalar_lea.vmem %s2700_s2, %s2079_s14 }
  0x1c   : > { %s2367_s16 = scalar_lea.vmem %s2698_s0, %s1978_s9 }
  0x1f   : > { %v2141_v0 = vld [vmem:[%s2702_s4 + $0x3c] ss:$28 sps:$4 sm:$0xff]   ;;  %vm355_vm0 = vcmask 621568   ;;  %v2247_v1 = vmov 0.0   ;;  %v2143_v2 = vld [vmem:[%s335_s13] sm:$0xff]   ;;  %vm2248_vm1 = vmmov 0  }
  0x20   : > { %2056 = vmatprep.subr.bf16.mxu0 %v2247_v1  ;;  %556 = vmatprep.subr.bf16.mxu1 %v2141_v0  ;;  %v2144_v3 = vld [vmem:[%s2702_s4 + $0x38] ss:$28 sps:$4 sm:$0xff]   ;;  %v360_v4 = vsel %vm355_vm0, %v2143_v2, 0  ;;  %v2145_v5 = vld [vmem:[%s2702_s4 + $0x4] ss:$28 sps:$4 sm:$0xff]   ;;  %vm534_vm2 = vcmask 64512  }
  0x21   : > { %2058 = vmatprep.mubr.msk.bf16.mxu0 %vm2248_vm1, %v2247_v1  ;;  %2057 = vmatpush3.bf16.xpose.msra.mxu0 %v360_v4  ;;  %v2149_v6 = vld [vmem:[%s2702_s4 + $0x44] ss:$28 sps:$4 sm:$0xff]   ;;  %v2156_v11 = vld [vmem:[%s2702_s4 + $0xc] ss:$28 sps:$4 sm:$0xff]   ;;  %v2165_v17 = vld [vmem:[%s2702_s4 + $0x14] ss:$28 sps:$4 sm:$0xff]  }
  0x22   : > { %557 = vmatpush1.bf16.xpose.msra.mxu1 %v2144_v3  ;;  %v347_v7 = vld [vmem:[%s2701_s3] sm:$0xf]  ;;  %597 = vmatprep.subr.bf16.mxu0 %v2149_v6  ;;  %v2159_v12 = vld [vmem:[%s2702_s4 + $0x4c] ss:$28 sps:$4 sm:$0xff]   ;;  %v2169_v18 = vld [vmem:[%s2362_s28 + $0x14] ss:$28 sps:$4 sm:$0xff]  }
  0x23   : > { %558 = vmatprep.subr.bf16.mxu1 %v2145_v5  ;;  %v2153_v8 = vld [vmem:[%s2362_s28 + $0x4] ss:$28 sps:$4 sm:$0xff]   ;;  %v2162_v13 = vld [vmem:[%s2362_s28 + $0xc] ss:$28 sps:$4 sm:$0xff]   ;;  %v2170_v23 = vld [vmem:[%s2702_s4 + $0x18] ss:$28 sps:$4 sm:$0xff]  }
  0x24   : > { %v2147_v9 = vld [vmem:[%s2702_s4 + $0x40] ss:$28 sps:$4 sm:$0xff]   ;;  %576 = vmatprep.mubr.bf16.mxu1 %v2153_v8  ;;  %v2154_v15 = vld [vmem:[%s2702_s4 + $0x8] ss:$28 sps:$4 sm:$0xff]   ;;  %v2166_v19 = vld [vmem:[%s2702_s4 + $0x50] ss:$28 sps:$4 sm:$0xff]  }
  0x25   : > { %v2150_v10 = vld [vmem:[%s2702_s4] ss:$28 sps:$4 sm:$0xff]   ;;  %v2157_v16 = vld [vmem:[%s2702_s4 + $0x48] ss:$28 sps:$4 sm:$0xff]   ;;  %v2163_v21 = vld [vmem:[%s2702_s4 + $0x10] ss:$28 sps:$4 sm:$0xff]  }
  0x26   : > { %v2151_v14 = vld [vmem:[%s2362_s28] ss:$28 sps:$4 sm:$0xff]   ;;  %v2160_v20 = vld [vmem:[%s2362_s28 + $0x8] ss:$28 sps:$4 sm:$0xff]   ;;  %v542_v22 = vsel %vm534_vm2, %v2166_v19, 0  ;;  %v539_v25 = vsel %vm534_vm2, %v2170_v23, 0 }
  0x27   : > { %v2167_v24 = vld [vmem:[%s2362_s28 + $0x10] ss:$28 sps:$4 sm:$0xff]   ;;  %v2171_v26 = vld [vmem:[%s2362_s28 + $0x18] ss:$28 sps:$4 sm:$0xff]   ;;  %vm714_vm6 = vcmask 130048   ;;  %vm788_vm7 = vcmask 252928  }
  0x28   : > { %2059 = vmatmul.mubr.msk.bf16.vlgmr.msra.gmra.mxu0 %vm355_vm0, %v347_v7  ;;  %vm801_vm8 = vcmask 248832  }
  0x29   : > { %598 = vmatpush1.bf16.xpose.msra.mxu0 %v2147_v9  ;;  %617 = vmatprep.mubr.bf16.mxu0 %v2162_v13 }
  0x2a   : > { %559 = vmatpush1.bf16.xpose.msra.mxu1 %v2150_v10  ;;  %599 = vmatprep.subr.bf16.mxu0 %v2156_v11 }
  0x2b   : > { %638 = vmatprep.subr.bf16.mxu1 %v2159_v12 }
  0x31   : > { %577 = vmatmul.mubr.bf16.vlgmr.msra.gmra.mxu1 %v2151_v14  ;;  %600 = vmatpush1.bf16.xpose.msra.mxu0 %v2154_v15 }
  0x32   : > { %639 = vmatpush1.bf16.xpose.msra.mxu1 %v2157_v16  ;;  %2062 = vmatprep.subr.bf16.mxu0 %v2247_v1 }
  0x33   : > { %640 = vmatprep.subr.bf16.mxu1 %v2165_v17  ;;  %658 = vmatprep.mubr.bf16.mxu1 %v2169_v18 }
  0x38   : > { %618 = vmatmul.mubr.bf16.vlgmr.msra.gmra.mxu0 %v2160_v20 }
  0x39   : > { %2063 = vmatpush3.bf16.xpose.msra.mxu0 %v542_v22  ;;  %2066 = vmatprep.mubr.msk.bf16.mxu0 %vm2248_vm1, %v2247_v1 }
  0x3a   : > { %641 = vmatpush1.bf16.xpose.msra.mxu1 %v2163_v21  ;;  %2064 = vmatprep.subr.bf16.mxu0 %v2247_v1 }
  0x3b   : > { %2070 = vmatprep.subr.mxu1 %v2247_v1 }
  0x41   : > { %659 = vmatmul.mubr.bf16.vlgmr.msra.gmra.mxu1 %v2167_v24  ;;  %2065 = vmatpush3.bf16.xpose.msra.mxu0 %v539_v25 }
  0x42   : > { %2074 = vmatprep.mubr.msk.f32.mxu1 %vm2248_vm1, %v2247_v1 }
  0x48   : > { %2067 = vmatmul.mubr.msk.bf16.vlgmr.msra.gmra.mxu0 %vm534_vm2, %v2171_v26 }
  0xe8   : > { %v396_v27 = vpop.f32.mrf.mxu0 }
  0xe9   : > { %v403_v55 = vmul.f32 0.01, %v396_v27  ;;  %vm402_vm5 = vcmp.gt.f32.partialorder %v396_v27, 0.0 }
  0xea   : > { %v2060_v28 = vpop.f32.mrf.mxu0 }
  0xeb   : > { %v404_v58 = vsel %vm402_vm5, %v396_v27, %v403_v55 }
  0xec   : > { %v399_v29 = vpop.f32.mrf.mxu0 }
  0xee   : > { %v2061_v30 = vpop.f32.mrf.mxu0 }
  0xf1   : > { %v578_v31 = vpop.f32.mrf.mxu1 }
  0xf3   : > { %v580_v32 = vpop.f32.mrf.mxu1 }
  0xf5   : > { %v581_v33 = vpop.f32.mrf.mxu1 }
  0xf7   : > { %v583_v34 = vpop.f32.mrf.mxu1 }
  0xf8   : > { %v619_v35 = vpop.f32.mrf.mxu0 }
  0xf9   : > { %v620_v43 = vadd.f32 %v619_v35, %v578_v31 }
  0xfa   : > { %v621_v36 = vpop.f32.mrf.mxu0 }
  0xfc   : > { %v622_v37 = vpop.f32.mrf.mxu0 }
  0xfd   : > { %v623_v45 = vadd.f32 %v622_v37, %v581_v33 }
  0xfe   : > { %v624_v38 = vpop.f32.mrf.mxu0 }
 0x101   : > { %v660_v39 = vpop.f32.mrf.mxu1 }
 0x102   : > { %v661_v46 = vadd.f32 %v660_v39, %v620_v43 }
 0x103   : > { %v662_v40 = vpop.f32.mrf.mxu1 }
 0x105   : > { %v663_v41 = vpop.f32.mrf.mxu1 }
 0x106   : > { %v664_v48 = vadd.f32 %v663_v41, %v623_v45 }
 0x107   : > { %v665_v42 = vpop.f32.mrf.mxu1 }
 0x108   : > { %v701_v44 = vpop.f32.mrf.mxu0 }
 0x109   : > { %v702_v49 = vadd.f32 %v701_v44, %v661_v46 }
 0x10a   : > { %v2068_v47 = vpop.f32.mrf.mxu0 }
 0x10b   : > { %v710_v53 = vmul.f32 0.01, %v702_v49  ;;  %vm708_vm4 = vcmp.gt.f32.partialorder %v702_v49, 0.0 }
 0x10c   : > { %v704_v50 = vpop.f32.mrf.mxu0 }
 0x10d   : > { %v705_v51 = vadd.f32 %v704_v50, %v664_v48  ;;  %v712_v57 = vsel %vm708_vm4, %v702_v49, %v710_v53 }
 0x10e   : > { %v2069_v52 = vpop.f32.mrf.mxu0 }
 0x10f   : > { %vm709_vm3 = vcmp.gt.f32.partialorder %v705_v51, 0.0  ;;  %v711_v54 = vmul.f32 0.01, %v705_v51 }
 0x111   : > { %v713_v56 = vsel %vm709_vm3, %v705_v51, %v711_v54 }
 0x112   : > { %2071 = vmatpush3.msra.mxu1 %v713_v56 }
 0x113   : > { %2072 = vmatprep.subr.mxu1 %v2247_v1 }
 0x114   : > { %2073 = vmatpush3.msra.mxu1 %v712_v57 }
 0x115   : > { %2075 = vmatmul.mubr.msk.f32.vlgmr.msra.gmra.mxu1 %vm714_vm6, %v404_v58 }
 0x1d5   : > { %v784_v59 = vpop.f32.mrf.mxu1 }
 0x1d6   : > { %v789_v60 = vsel %vm788_vm7, %v784_v59, -inf }
 0x1d7   : > { %790 = vmax.xlane.f32.xlu0 %v789_v60  ;;  %v2076_v61 = vpop.f32.mrf.mxu1 }
 0x260   : > { %v791_v62 = vpop.xlane.xlu0 %790 }
 0x261   : > { %v792_v63 = vsub.f32 %v784_v59, %v791_v62 }
 0x263   : > { %v793_v0 = vmul.f32 1.442695, %v792_v63 }
 0x265   : > { %2172 = vpow2.f32 %v793_v0 }
 0x272   : > { %v2173_v2 = vpop.eup %2172 }
 0x273   : > { %v795_v3 = vsel %vm788_vm7, %v2173_v2, 0.0 }
 0x274   : > { %796 = vadd.xlane.f32.xlu0 %v795_v3 }
 0x2fd   : > { %v797_v4 = vpop.xlane.xlu0 %796 }
 0x2fe   : > { %2174 = vrcp.f32 %v797_v4 }
 0x30b   : > { %v2175_v5 = vpop.eup %2174 }
 0x30c   : > { %v799_v1 = vmul.f32 %v2175_v5, %v2173_v2 }
 0x30e   : > { %v800_v6 = vpack.c.bf16 %v799_v1, %v799_v1 }
 0x310   : > { %802 = vst.msk [vmem:[#allocation2] sm:$0xf] %vm801_vm8, %v800_v6 }
 0x311 PF: > { %v2441_v7 = vld [vmem:[%s2367_s16 + $0xc] ss:$36 sps:$4 sm:$0x1f]   ;;  %s2249_s28 = smov 64   ;;  %v2250_v12 = vmov 0   ;;  %v1445_v17 = vld [vmem:[%s2704_s6] sm:$0xff] }
 0x312   : > { %859 = vrot.lane.b32.xlu1 %v2441_v7, %s2249_s28  ;;  %v2181_v8 = vld [vmem:[%s2367_s16 + $0x4] ss:$36 sps:$4 sm:$0x1f]   ;;  %v2446_v9 = vld [vmem:[%s2367_s16 + $0x10] ss:$36 sps:$4 sm:$0x1f]   ;;  %985 = vmatprep.mubr.bf16.mxu1 %v2250_v12 }
 0x313   : > { %v2449_v10 = vld [vmem:[%s2367_s16 + $0x8] ss:$36 sps:$4 sm:$0x1f]   ;;  %855 = vrot.lane.b32.xlu0 %v2181_v8, %s2249_s28  ;;  %v2453_v11 = vld [vmem:[%s2367_s16 + $0x14] ss:$36 sps:$4 sm:$0x1f]   ;;  %944 = vmatprep.mubr.bf16.mxu0 %v2250_v12 }
 0x314   : > { %v2458_v13 = vld [vmem:[%s2367_s16] ss:$36 sps:$4 sm:$0x1f]   ;;  %2176 = vset.pattern.permute.xlu1 %v2250_v12  ;;  %v2468_v15 = vld [vmem:[%s2367_s16 + $0x18] ss:$36 sps:$4 sm:$0x1f]  }
 0x315   : > { %v2464_v14 = vld [vmem:[%s2367_s16 + $0x1c] ss:$36 sps:$4 sm:$0x1f]   ;;  %vm884_vm9 = vcmask 1043456   ;;  %vm885_vm10 = vcmask 1044480   ;;  %v2251_v19 = vmov 65535  }
 0x316   : > { %861 = vrot.lane.b32.xlu1 %v2446_v9, %s2249_s28  ;;  %v2473_v16 = vld [vmem:[%s2367_s16 + $0x20] ss:$36 sps:$4 sm:$0x1f]   ;;  %v886_v20 = vsel %vm884_vm9, 4294967295, %v2251_v19  ;;  %vm871_vm11 = vcmask 523264   ;;  %vm880_vm12 = vcmask 72704  }
 0x317   : > { %857 = vrot.lane.b32.xlu0 %v2449_v10, %s2249_s28  ;;  %v1483_v18 = vld [vmem:[#allocation2] sm:$0xf]  ;;  %v2481_v22 = vsel %vm885_vm10, %v886_v20, 0  ;;  %v814_v34 = vld [vmem:[%s2703_s5 + $0x4] sm:$0xf]  ;;  %vm1508_vm1 = vcmask 64512  }
 0x318   : > { %v1083_v41 = vand.u32 %v2181_v8, %v2481_v22  ;;  %v1089_v47 = vand.u32 %v2441_v7, %v2481_v22  ;;  %v1080_v50 = vand.u32 %v2458_v13, %v2481_v22  ;;  %v1086_v51 = vand.u32 %v2449_v10, %v2481_v22  ;;  %v813_v55 = vld [vmem:[%s2703_s5] sm:$0xf]  ;;  %v815_v58 = vld [vmem:[%s2703_s5 + $0x8] sm:$0xf]  ;;  %s2042_s18 = sshll.u32 (%p2338_p5), %s2229_s26, 3  ;;  %s2043_s19 = sshll.u32 (%p2338_p5), %s2233_s27, 7 }
 0x319   : > { %v1095_v52 = vand.u32 %v2453_v11, %v2481_v22  ;;  %v1101_v53 = vand.u32 %v2464_v14, %v2481_v22  ;;  %v1092_v54 = vand.u32 %v2446_v9, %v2481_v22  ;;  %v1098_v56 = vand.u32 %v2468_v15, %v2481_v22  ;;  %s1792_s12 = sadd.s32 (%p2338_p5), %s2043_s19, %s2042_s18 }
 0x31a   : > { %863 = vrot.lane.b32.xlu1 %v2453_v11, %s2249_s28  ;;  %v1271_v57 = vand.u32 %v2473_v16, %v2481_v22  ;;  %s2044_s21 = sshll.u32 (%p2338_p5), %s1792_s12, 3 }
 0x31b   : > { %853 = vrot.lane.b32.xlu0 %v2458_v13, %s2249_s28  ;;  %s2620_s11 = scalar_lea.vmem (%p2338_p5), %s2705_s7, %s2044_s21 }
 0x31e   : > { %867 = vrot.lane.b32.xlu1 %v2464_v14, %s2249_s28 }
 0x31f   : > { %865 = vrot.lane.b32.xlu0 %v2468_v15, %s2249_s28 }
 0x322   : > { %1448 = vperm.xlu1 %2176, %v1445_v17  }
 0x323   : > { %869 = vrot.lane.b32.xlu0 %v2473_v16, %s2249_s28 }
 0x341   : > { %1492 = vxpose.xlu0.c.b16.start.end [1/1] (short) (narrow) %v1483_v18, 32 }
 0x34a   : > { %2177 = vset.pattern.permute.xlu0 %v2250_v12 }
 0x384   : > { %v860_v21 = vpop.permute.xlu1 %859 }
 0x385   : > { %v856_v23 = vpop.permute.xlu0 %855 }
 0x388   : > { %v862_v24 = vpop.permute.xlu1 %861 }
 0x389   : > { %v875_v25 = vsel %vm871_vm11, %v860_v21, %v862_v24  ;;  %v858_v27 = vpop.permute.xlu0 %857 }
 0x38a   : > { %v898_v26 = vand.u32 %v2481_v22, %v875_v25  ;;  %v874_v28 = vsel %vm871_vm11, %v858_v27, %v860_v21  ;;  %v873_v29 = vsel %vm871_vm11, %v856_v23, %v858_v27 }
 0x38b   : > { %v892_v30 = vand.u32 %v2481_v22, %v873_v29  ;;  %v895_v31 = vand.u32 %v2481_v22, %v874_v28 }
 0x38c   : > { %967 = vmatprep.subr.bf16.mxu1 %v898_v26  ;;  %v864_v32 = vpop.permute.xlu1 %863 }
 0x38d   : > { %926 = vmatprep.subr.bf16.mxu0 %v892_v30  ;;  %v854_v33 = vpop.permute.xlu0 %853  ;;  %968 = vmatpush1.bf16.msra.mxu1 %v895_v31  ;;  %v876_v37 = vsel %vm871_vm11, %v862_v24, %v864_v32 }
 0x38e   : > { %v872_v35 = vsel %vm871_vm11, %v854_v33, %v856_v23  ;;  %v901_v43 = vand.u32 %v2481_v22, %v876_v37 }
 0x38f   : > { %v889_v36 = vand.u32 %v2481_v22, %v872_v35 }
 0x390   : > { %2018 = vmatmul.mubr.msk.bf16.vlgmr.msra.gmra.mxu1 %vm880_vm12, %v814_v34  ;;  %v868_v39 = vpop.permute.xlu1 %867 }
 0x391   : > { %927 = vmatpush1.bf16.msra.mxu0 %v889_v36  ;;  %v866_v38 = vpop.permute.xlu0 %865  ;;  %1067 = vmatprep.mubr.bf16.mxu1 %v2250_v12 }
 0x392   : > { %v877_v40 = vsel %vm871_vm11, %v864_v32, %v866_v38  ;;  %v878_v44 = vsel %vm871_vm11, %v866_v38, %v868_v39 }
 0x393   : > { %v904_v42 = vand.u32 %v2481_v22, %v877_v40  ;;  %v907_v49 = vand.u32 %v2481_v22, %v878_v44 }
 0x394   : > { %2017 = vmatmul.mubr.msk.bf16.vlgmr.msra.gmra.mxu0 %vm880_vm12, %v814_v34 }
 0x395   : > { %1008 = vmatprep.subr.bf16.mxu0 %v904_v42  ;;  %v870_v45 = vpop.permute.xlu0 %869  ;;  %1026 = vmatprep.mubr.bf16.mxu0 %v2250_v12 }
 0x396   : > { %v879_v46 = vsel %vm871_vm11, %v868_v39, %v870_v45  ;;  %1009 = vmatpush1.bf16.msra.mxu0 %v901_v43 }
 0x397   : > { %v910_v48 = vand.u32 %v2481_v22, %v879_v46  ;;  %1117 = vmatprep.subr.bf16.mxu0 %v1083_v41 }
 0x399   : > { %1049 = vmatprep.subr.bf16.mxu1 %v910_v48 }
 0x39a   : > { %1050 = vmatpush1.bf16.msra.mxu1 %v907_v49 }
 0x39b   : > { %1158 = vmatprep.subr.bf16.mxu1 %v1089_v47 }
 0x39c   : > { %2019 = vmatmul.mubr.msk.bf16.vlgmr.msra.gmra.mxu0 %vm880_vm12, %v814_v34 }
 0x39d   : > { %2020 = vmatmul.mubr.msk.bf16.vlgmr.msra.gmra.mxu1 %vm880_vm12, %v814_v34  ;;  %1118 = vmatpush1.bf16.msra.mxu0 %v1080_v50  ;;  %v1449_v31 = vpop.permute.xlu1 %1448 }
 0x39e   : > { %1159 = vmatpush1.bf16.msra.mxu1 %v1086_v51  ;;  %1135 = vmatprep.mubr.bf16.mxu0 %v2250_v12 }
 0x39f   : > { %1176 = vmatprep.mubr.bf16.mxu1 %v2250_v12  ;;  %1199 = vmatprep.subr.bf16.mxu0 %v1095_v52 }
 0x3a0   : > { %1240 = vmatprep.subr.bf16.mxu1 %v1101_v53 }
 0x3a4   : > { %2021 = vmatmul.mubr.msk.bf16.vlgmr.msra.gmra.mxu0 %vm880_vm12, %v813_v55 }
 0x3a5   : > { %2022 = vmatmul.mubr.msk.bf16.vlgmr.msra.gmra.mxu1 %vm880_vm12, %v813_v55  ;;  %1200 = vmatpush1.bf16.msra.mxu0 %v1092_v54 }
 0x3a6   : > { %1241 = vmatpush1.bf16.msra.mxu1 %v1098_v56  ;;  %1217 = vmatprep.mubr.bf16.mxu0 %v2250_v12 }
 0x3a7   : > { %1258 = vmatprep.mubr.bf16.mxu1 %v2250_v12  ;;  %1287 = vmatprep.subr.bf16.mxu0 %v1086_v51 }
 0x3a8   : > { %1328 = vmatprep.subr.bf16.mxu1 %v1092_v54 }
 0x3ac   : > { %2023 = vmatmul.mubr.msk.bf16.vlgmr.msra.gmra.mxu0 %vm880_vm12, %v813_v55 }
 0x3ad   : > { %2024 = vmatmul.mubr.msk.bf16.vlgmr.msra.gmra.mxu1 %vm880_vm12, %v813_v55  ;;  %1288 = vmatpush1.bf16.msra.mxu0 %v1083_v41 }
 0x3ae   : > { %1329 = vmatpush1.bf16.msra.mxu1 %v1089_v47  ;;  %1305 = vmatprep.mubr.bf16.mxu0 %v2250_v12 }
 0x3af   : > { %1346 = vmatprep.mubr.bf16.mxu1 %v2250_v12  ;;  %1369 = vmatprep.subr.bf16.mxu0 %v1098_v56 }
 0x3b0   : > { %1410 = vmatprep.subr.bf16.mxu1 %v1271_v57 }
 0x3b4   : > { %2025 = vmatmul.mubr.msk.bf16.vlgmr.msra.gmra.mxu0 %vm880_vm12, %v815_v58 }
 0x3b5   : > { %2026 = vmatmul.mubr.msk.bf16.vlgmr.msra.gmra.mxu1 %vm880_vm12, %v815_v58  ;;  %1370 = vmatpush1.bf16.msra.mxu0 %v1095_v52 }
 0x3b6   : > { %1411 = vmatpush1.bf16.msra.mxu1 %v1101_v53  ;;  %1387 = vmatprep.mubr.bf16.mxu0 %v2250_v12 }
 0x3b7   : > { %1428 = vmatprep.mubr.bf16.mxu1 %v2250_v12 }
 0x3bc   : > { %2027 = vmatmul.mubr.msk.bf16.vlgmr.msra.gmra.mxu0 %vm880_vm12, %v815_v58 }
 0x3bd   : > { %2028 = vmatmul.mubr.msk.bf16.vlgmr.msra.gmra.mxu1 %vm880_vm12, %v815_v58  ;;  %1571 = vmatprep.mubr.bf16.mxu0 %v2250_v12 }
 0x3be   : > { %1624 = vmatprep.mubr.bf16.mxu1 %v2250_v12 }
 0x450   : > { %v987_v59 = vpop.f32.mrf.mxu1 }
 0x452   : > { %v989_v60 = vpop.f32.mrf.mxu1 }
 0x454   : > { %v946_v61 = vpop.f32.mrf.mxu0  ;;  %v991_v62 = vpop.f32.mrf.mxu1 }
 0x456   : > { %v948_v63 = vpop.f32.mrf.mxu0  ;;  %v992_v0 = vpop.f32.mrf.mxu1 }
 0x458   : > { %v950_v2 = vpop.f32.mrf.mxu0 }
 0x45a   : > { %v951_v3 = vpop.f32.mrf.mxu0 }
 0x45c   : > { %v1028_v4 = vpop.f32.mrf.mxu0 }
 0x45d   : > { %v1069_v5 = vpop.f32.mrf.mxu1 }
 0x45e   : > { %v1030_v1 = vpop.f32.mrf.mxu0 }
 0x45f   : > { %v1071_v6 = vpop.f32.mrf.mxu1 }
 0x460   : > { %v1032_v7 = vpop.f32.mrf.mxu0 }
 0x461   : > { %v1073_v8 = vpop.f32.mrf.mxu1 }
 0x462   : > { %v1033_v9 = vpop.f32.mrf.mxu0 }
 0x463   : > { %v1074_v10 = vpop.f32.mrf.mxu1 }
 0x464   : > { %v1137_v11 = vpop.f32.mrf.mxu0 }
 0x465   : > { %v1178_v13 = vpop.f32.mrf.mxu1  ;;  %v1138_v27 = vadd.f32 %v1137_v11, %v946_v61 }
 0x466   : > { %v1139_v14 = vpop.f32.mrf.mxu0  ;;  %v1179_v29 = vadd.f32 %v1178_v13, %v987_v59 }
 0x467   : > { %v1180_v15 = vpop.f32.mrf.mxu1  ;;  %v1140_v32 = vadd.f32 %v1139_v14, %v948_v63 }
 0x468   : > { %v1141_v16 = vpop.f32.mrf.mxu0  ;;  %v1181_v35 = vadd.f32 %v1180_v15, %v989_v60 }
 0x469   : > { %v1182_v17 = vpop.f32.mrf.mxu1 }
 0x46a   : > { %v1142_v18 = vpop.f32.mrf.mxu0 }
 0x46b   : > { %v1183_v19 = vpop.f32.mrf.mxu1  ;;  %v1500_v18 = vpop.trf.xlu0 }
 0x46c   : > { %v1219_v20 = vpop.f32.mrf.mxu0 }
 0x46d   : > { %v1260_v21 = vpop.f32.mrf.mxu1  ;;  %v1220_v47 = vadd.f32 %v1219_v20, %v1028_v4 }
 0x46e   : > { %v1221_v22 = vpop.f32.mrf.mxu0  ;;  %v1261_v51 = vadd.f32 %v1260_v21, %v1069_v5 }
 0x46f   : > { %v1262_v23 = vpop.f32.mrf.mxu1  ;;  %v1222_v59 = vadd.f32 %v1221_v22, %v1030_v1 }
 0x470   : > { %v1223_v24 = vpop.f32.mrf.mxu0  ;;  %v1263_v0 = vadd.f32 %v1262_v23, %v1071_v6 }
 0x471   : > { %v1264_v25 = vpop.f32.mrf.mxu1 }
 0x472   : > { %v1224_v26 = vpop.f32.mrf.mxu0 }
 0x473   : > { %v1265_v28 = vpop.f32.mrf.mxu1 }
 0x474   : > { %v1307_v30 = vpop.f32.mrf.mxu0 }
 0x475   : > { %v1437_v33 = vadd.f32 %v1307_v30, %v1138_v27  ;;  %v1348_v34 = vpop.f32.mrf.mxu1 }
 0x476   : > { %v1439_v36 = vadd.f32 %v1348_v34, %v1179_v29  ;;  %v1309_v37 = vpop.f32.mrf.mxu0 }
 0x477   : > { %v1438_v38 = vadd.f32 %v1309_v37, %v1140_v32  ;;  %v1350_v39 = vpop.f32.mrf.mxu1  ;;  %v1451_v40 = vadd.f32 %v1449_v31, %v1437_v33 }
 0x478   : > { %v1440_v41 = vadd.f32 %v1350_v39, %v1181_v35  ;;  %v1311_v42 = vpop.f32.mrf.mxu0  ;;  %v1453_v43 = vadd.f32 %v1449_v31, %v1439_v36  ;;  %v1501_v35 = vpop.trf.xlu0 }
 0x479   : > { %v1452_v44 = vadd.f32 %v1449_v31, %v1438_v38  ;;  %v1352_v45 = vpop.f32.mrf.mxu1  ;;  %vm1459_vm13 = vcmp.gt.f32.partialorder %v1451_v40, 0.0  ;;  %v1467_v46 = vmul.f32 0.01, %v1451_v40 }
 0x47a   : > { %v1454_v48 = vadd.f32 %v1449_v31, %v1440_v41  ;;  %v1312_v49 = vpop.f32.mrf.mxu0  ;;  %vm1461_vm14 = vcmp.gt.f32.partialorder %v1453_v43, 0.0  ;;  %v1469_v50 = vmul.f32 0.01, %v1453_v43 }
 0x47b   : > { %vm1460_vm15 = vcmp.gt.f32.partialorder %v1452_v44, 0.0  ;;  %v1468_v52 = vmul.f32 0.01, %v1452_v44  ;;  %v1353_v53 = vpop.f32.mrf.mxu1  ;;  %v1475_v54 = vsel %vm1459_vm13, %v1451_v40, %v1467_v46 }
 0x47c   : > { %vm1462_vm0 = vcmp.gt.f32.partialorder %v1454_v48, 0.0  ;;  %v1470_v55 = vmul.f32 0.01, %v1454_v48  ;;  %v1389_v56 = vpop.f32.mrf.mxu0  ;;  %v1484_v57 = vpack.c.bf16 %v1475_v54, %v1475_v54  ;;  %v1477_v58 = vsel %vm1461_vm14, %v1453_v43, %v1469_v50 }
 0x47d   : > { %v1476_v60 = vsel %vm1460_vm15, %v1452_v44, %v1468_v52  ;;  %v1441_v61 = vadd.f32 %v1389_v56, %v1220_v47  ;;  %v1430_v62 = vpop.f32.mrf.mxu1  ;;  %v1486_v63 = vpack.c.bf16 %v1477_v58, %v1477_v58 }
 0x47e   : > { %v1485_v2 = vpack.c.bf16 %v1476_v60, %v1476_v60  ;;  %v1478_v3 = vsel %vm1462_vm0, %v1454_v48, %v1470_v55  ;;  %v1443_v4 = vadd.f32 %v1430_v62, %v1261_v51  ;;  %v1391_v7 = vpop.f32.mrf.mxu0  ;;  %v1516_v1 = vsel %vm884_vm9, %v1484_v57, 0 }
 0x47f   : > { %v1487_v5 = vpack.c.bf16 %v1478_v3, %v1478_v3  ;;  %v1455_v8 = vadd.f32 %v1449_v31, %v1441_v61  ;;  %v1442_v9 = vadd.f32 %v1391_v7, %v1222_v59  ;;  %v1432_v10 = vpop.f32.mrf.mxu1  ;;  %v1522_v17 = vsel %vm884_vm9, %v1486_v63, 0 }
 0x480   : > { %v1457_v11 = vadd.f32 %v1449_v31, %v1443_v4  ;;  %v1444_v13 = vadd.f32 %v1432_v10, %v1263_v0  ;;  %v1393_v14 = vpop.f32.mrf.mxu0  ;;  %2029 = vmatprep.subr.msk.bf16.mxu0 %vm884_vm9, %v1485_v2 }
 0x481   : > { %vm1463_vm2 = vcmp.gt.f32.partialorder %v1455_v8, 0.0  ;;  %v1471_v15 = vmul.f32 0.01, %v1455_v8  ;;  %v1456_v16 = vadd.f32 %v1449_v31, %v1442_v9  ;;  %v1434_v6 = vpop.f32.mrf.mxu1  ;;  %1554 = vmatpush1.bf16.msra.mxu0 %v1516_v1  ;;  %2032 = vmatprep.subr.msk.bf16.mxu1 %vm884_vm9, %v1487_v5 }
 0x482   : > { %vm1465_vm3 = vcmp.gt.f32.partialorder %v1457_v11, 0.0  ;;  %v1473_v19 = vmul.f32 0.01, %v1457_v11  ;;  %v1458_v20 = vadd.f32 %v1449_v31, %v1444_v13  ;;  %v1394_v21 = vpop.f32.mrf.mxu0  ;;  %1607 = vmatpush1.bf16.msra.mxu1 %v1522_v17 }
 0x483   : > { %vm1464_vm4 = vcmp.gt.f32.partialorder %v1456_v16, 0.0  ;;  %v1472_v22 = vmul.f32 0.01, %v1456_v16  ;;  %v1435_v23 = vpop.f32.mrf.mxu1  ;;  %v1479_v24 = vsel %vm1463_vm2, %v1455_v8, %v1471_v15 }
 0x484   : > { %vm1466_vm5 = vcmp.gt.f32.partialorder %v1458_v20, 0.0  ;;  %v1474_v25 = vmul.f32 0.01, %v1458_v20  ;;  %2030 = vmatmul.mubr.msk.bf16.vlgmr.msra.gmra.mxu0 %vm1508_vm1, %v1500_v18  ;;  %v1488_v26 = vpack.c.bf16 %v1479_v24, %v1479_v24  ;;  %v1481_v27 = vsel %vm1465_vm3, %v1457_v11, %v1473_v19 }
 0x485   : > { %v1480_v28 = vsel %vm1464_vm4, %v1456_v16, %v1472_v22  ;;  %2033 = vmatmul.mubr.msk.bf16.vlgmr.msra.gmra.mxu1 %vm1508_vm1, %v1500_v18  ;;  %v1490_v29 = vpack.c.bf16 %v1481_v27, %v1481_v27  ;;  %1581 = vmatprep.mubr.bf16.mxu0 %v2250_v12 }
 0x486   : > { %v1489_v30 = vpack.c.bf16 %v1480_v28, %v1480_v28  ;;  %v1482_v31 = vsel %vm1466_vm5, %v1458_v20, %v1474_v25  ;;  %1634 = vmatprep.mubr.bf16.mxu1 %v2250_v12  ;;  %v1528_v33 = vsel %vm884_vm9, %v1488_v26, 0 }
 0x487   : > { %v1491_v32 = vpack.c.bf16 %v1482_v31, %v1482_v31  ;;  %v1534_v34 = vsel %vm884_vm9, %v1490_v29, 0 }
 0x488   : > { %2035 = vmatprep.subr.msk.bf16.mxu0 %vm884_vm9, %v1489_v30 }
 0x489   : > { %1660 = vmatpush1.bf16.msra.mxu0 %v1528_v33  ;;  %2038 = vmatprep.subr.msk.bf16.mxu1 %vm884_vm9, %v1491_v32 }
 0x48a   : > { %1713 = vmatpush1.bf16.msra.mxu1 %v1534_v34 }
 0x48c   : > { %2031 = vmatmul.mubr.msk.bf16.gmra.mxu0 %vm1508_vm1, %v1501_v35 }
 0x48d   : > { %2034 = vmatmul.mubr.msk.bf16.gmra.mxu1 %vm1508_vm1, %v1501_v35  ;;  %1677 = vmatprep.mubr.bf16.mxu0 %v2250_v12 }
 0x48e   : > { %1730 = vmatprep.mubr.bf16.mxu1 %v2250_v12 }
 0x494   : > { %2036 = vmatmul.mubr.msk.bf16.vlgmr.msra.gmra.mxu0 %vm1508_vm1, %v1500_v18 }
 0x495   : > { %2039 = vmatmul.mubr.msk.bf16.vlgmr.msra.gmra.mxu1 %vm1508_vm1, %v1500_v18  ;;  %1687 = vmatprep.mubr.bf16.mxu0 %v2250_v12 }
 0x496   : > { %1740 = vmatprep.mubr.bf16.mxu1 %v2250_v12 }
 0x49c   : > { %2037 = vmatmul.mubr.msk.bf16.gmra.mxu0 %vm1508_vm1, %v1501_v35 }
 0x49d   : > { %2040 = vmatmul.mubr.msk.bf16.gmra.mxu1 %vm1508_vm1, %v1501_v35 }
 0x544   : > { %v1573_v36 = vpop.f32.mrf.mxu0 }
 0x545   : > { %1751 = vst [vmem:[%s2369_s25] sm:$0xff] %v1573_v36  ;;  %v1626_v37 = vpop.f32.mrf.mxu1 }
 0x546   : > { %1753 = vst [vmem:[%s2369_s25 + $0x10] sm:$0xff] %v1626_v37  ;;  %v1575_v38 = vpop.f32.mrf.mxu0 }
 0x547   : > { %1752 = vst [vmem:[%s2369_s25 + $0x8] sm:$0xff] %v1575_v38  ;;  %v1628_v39 = vpop.f32.mrf.mxu1 }
 0x548   : > { %1754 = vst [vmem:[%s2369_s25 + $0x18] sm:$0xff] %v1628_v39  ;;  %v1577_v40 = vpop.f32.mrf.mxu0 }
 0x549   : > { %1759 = vst [vmem:[%s2369_s25 + $0x40] sm:$0xff] %v1577_v40  ;;  %v1630_v12 = vpop.f32.mrf.mxu1 }
 0x54a   : > { %1761 = vst [vmem:[%s2369_s25 + $0x50] sm:$0xff] %v1630_v12  ;;  %v1579_v41 = vpop.f32.mrf.mxu0 }
 0x54b   : > { %1760 = vst [vmem:[%s2369_s25 + $0x48] sm:$0xff] %v1579_v41  ;;  %v1632_v42 = vpop.f32.mrf.mxu1 }
 0x54c   : > { %1762 = vst [vmem:[%s2369_s25 + $0x58] sm:$0xff] %v1632_v42  ;;  %v1583_v43 = vpop.f32.mrf.mxu0  ;;  %v1807_v4 = vld [vmem:[%s2369_s25] sm:$0xff] (%p2338_p5) }
 0x54d   : > { %1767 = vst [vmem:[%s2369_s25 + $0x80] sm:$0xff] %v1583_v43  ;;  %v1636_v44 = vpop.f32.mrf.mxu1  ;;  %v1811_v5 = vld [vmem:[%s2369_s25 + $0x10] sm:$0xff] (%p2338_p5)  ;;  %1808 = vst [vmem:[%s2620_s11] sm:$0xff] (%p2338_p5), %v1807_v4 }
 0x54e   : > { %1769 = vst [vmem:[%s2369_s25 + $0x90] sm:$0xff] %v1636_v44  ;;  %v1585_v45 = vpop.f32.mrf.mxu0  ;;  %v1809_v7 = vld [vmem:[%s2369_s25 + $0x8] sm:$0xff] (%p2338_p5)  ;;  %1812 = vst [vmem:[%s2620_s11 + $0x10] sm:$0xff] (%p2338_p5), %v1811_v5 }
 0x54f   : > { %1768 = vst [vmem:[%s2369_s25 + $0x88] sm:$0xff] %v1585_v45  ;;  %v1638_v46 = vpop.f32.mrf.mxu1  ;;  %v1813_v8 = vld [vmem:[%s2369_s25 + $0x18] sm:$0xff] (%p2338_p5)  ;;  %1810 = vst [vmem:[%s2620_s11 + $0x8] sm:$0xff] (%p2338_p5), %v1809_v7 }
 0x550   : > { %1770 = vst [vmem:[%s2369_s25 + $0x98] sm:$0xff] %v1638_v46  ;;  %v1587_v47 = vpop.f32.mrf.mxu0  ;;  %v1823_v14 = vld [vmem:[%s2369_s25 + $0x40] sm:$0xff] (%p2338_p5)  ;;  %1814 = vst [vmem:[%s2620_s11 + $0x18] sm:$0xff] (%p2338_p5), %v1813_v8 }
 0x551   : > { %1775 = vst [vmem:[%s2369_s25 + $0xc0] sm:$0x7f] %v1587_v47  ;;  %v1640_v48 = vpop.f32.mrf.mxu1  ;;  %v1827_v15 = vld [vmem:[%s2369_s25 + $0x50] sm:$0xff] (%p2338_p5)  ;;  %1824 = vst [vmem:[%s2620_s11 + $0x100] sm:$0xff] (%p2338_p5), %v1823_v14 }
 0x552   : > { %1777 = vst [vmem:[%s2369_s25 + $0xd0] sm:$0x7f] %v1640_v48  ;;  %v1589_v49 = vpop.f32.mrf.mxu0  ;;  %v1825_v1 = vld [vmem:[%s2369_s25 + $0x48] sm:$0xff] (%p2338_p5)  ;;  %1828 = vst [vmem:[%s2620_s11 + $0x110] sm:$0xff] (%p2338_p5), %v1827_v15 }
 0x553   : > { %1776 = vst [vmem:[%s2369_s25 + $0xc8] sm:$0x7f] %v1589_v49  ;;  %v1642_v50 = vpop.f32.mrf.mxu1  ;;  %v1829_v16 = vld [vmem:[%s2369_s25 + $0x58] sm:$0xff] (%p2338_p5)  ;;  %1826 = vst [vmem:[%s2620_s11 + $0x108] sm:$0xff] (%p2338_p5), %v1825_v1 }
 0x554   : > { %1778 = vst [vmem:[%s2369_s25 + $0xd8] sm:$0x7f] %v1642_v50  ;;  %v1679_v51 = vpop.f32.mrf.mxu0  ;;  %1830 = vst [vmem:[%s2620_s11 + $0x118] sm:$0xff] (%p2338_p5), %v1829_v16  ;;  %v1839_v20 = vld [vmem:[%s2369_s25 + $0x80] sm:$0xff] (%p2338_p5) }
 0x555   : > { %1755 = vst [vmem:[%s2369_s25 + $0x20] sm:$0xff] %v1679_v51  ;;  %v1732_v52 = vpop.f32.mrf.mxu1  ;;  %1840 = vst [vmem:[%s2620_s11 + $0x200] sm:$0xff] (%p2338_p5), %v1839_v20  ;;  %v1843_v22 = vld [vmem:[%s2369_s25 + $0x90] sm:$0xff] (%p2338_p5) }
 0x556   : > { %1757 = vst [vmem:[%s2369_s25 + $0x30] sm:$0xff] %v1732_v52  ;;  %v1681_v53 = vpop.f32.mrf.mxu0  ;;  %v1841_v21 = vld [vmem:[%s2369_s25 + $0x88] sm:$0xff] (%p2338_p5)  ;;  %1844 = vst [vmem:[%s2620_s11 + $0x210] sm:$0xff] (%p2338_p5), %v1843_v22 }
 0x557   : > { %1756 = vst [vmem:[%s2369_s25 + $0x28] sm:$0xff] %v1681_v53  ;;  %v1734_v54 = vpop.f32.mrf.mxu1  ;;  %1842 = vst [vmem:[%s2620_s11 + $0x208] sm:$0xff] (%p2338_p5), %v1841_v21  ;;  %v1845_v23 = vld [vmem:[%s2369_s25 + $0x98] sm:$0xff] (%p2338_p5) }
 0x558   : > { %1758 = vst [vmem:[%s2369_s25 + $0x38] sm:$0xff] %v1734_v54  ;;  %v1683_v55 = vpop.f32.mrf.mxu0  ;;  %1846 = vst [vmem:[%s2620_s11 + $0x218] sm:$0xff] (%p2338_p5), %v1845_v23  ;;  %v1855_v28 = vld [vmem:[%s2369_s25 + $0xc0] sm:$0xff] (%p2338_p5) }
 0x559   : > { %1763 = vst [vmem:[%s2369_s25 + $0x60] sm:$0xff] %v1683_v55  ;;  %v1736_v56 = vpop.f32.mrf.mxu1  ;;  %v1859_v30 = vld [vmem:[%s2369_s25 + $0xd0] sm:$0xff] (%p2338_p5)  ;;  %1856 = vst [vmem:[%s2620_s11 + $0x300] sm:$0xff] (%p2338_p5), %v1855_v28 }
 0x55a   : > { %1765 = vst [vmem:[%s2369_s25 + $0x70] sm:$0xff] %v1736_v56  ;;  %v1685_v57 = vpop.f32.mrf.mxu0  ;;  %v1857_v29 = vld [vmem:[%s2369_s25 + $0xc8] sm:$0xff] (%p2338_p5)  ;;  %1860 = vst [vmem:[%s2620_s11 + $0x310] sm:$0xff] (%p2338_p5), %v1859_v30 }
 0x55b   : > { %1764 = vst [vmem:[%s2369_s25 + $0x68] sm:$0xff] %v1685_v57  ;;  %v1738_v58 = vpop.f32.mrf.mxu1  ;;  %1858 = vst [vmem:[%s2620_s11 + $0x308] sm:$0xff] (%p2338_p5), %v1857_v29  ;;  %v1861_v31 = vld [vmem:[%s2369_s25 + $0xd8] sm:$0xff] (%p2338_p5) }
 0x55c   : > { %1766 = vst [vmem:[%s2369_s25 + $0x78] sm:$0xff] %v1738_v58  ;;  %v1689_v59 = vpop.f32.mrf.mxu0  ;;  %v1815_v9 = vld [vmem:[%s2369_s25 + $0x20] sm:$0xff] (%p2338_p5)  ;;  %1862 = vst [vmem:[%s2620_s11 + $0x318] sm:$0xff] (%p2338_p5), %v1861_v31 }
 0x55d   : > { %1771 = vst [vmem:[%s2369_s25 + $0xa0] sm:$0xff] %v1689_v59  ;;  %v1742_v60 = vpop.f32.mrf.mxu1  ;;  %v1819_v11 = vld [vmem:[%s2369_s25 + $0x30] sm:$0xff] (%p2338_p5)  ;;  %1816 = vst [vmem:[%s2620_s11 + $0x20] sm:$0xff] (%p2338_p5), %v1815_v9 }
 0x55e   : > { %1773 = vst [vmem:[%s2369_s25 + $0xb0] sm:$0xff] %v1742_v60  ;;  %v1691_v61 = vpop.f32.mrf.mxu0  ;;  %v1817_v10 = vld [vmem:[%s2369_s25 + $0x28] sm:$0xff] (%p2338_p5)  ;;  %1820 = vst [vmem:[%s2620_s11 + $0x30] sm:$0xff] (%p2338_p5), %v1819_v11 }
 0x55f   : > { %1772 = vst [vmem:[%s2369_s25 + $0xa8] sm:$0xff] %v1691_v61  ;;  %v1744_v62 = vpop.f32.mrf.mxu1  ;;  %v1821_v13 = vld [vmem:[%s2369_s25 + $0x38] sm:$0xff] (%p2338_p5)  ;;  %1818 = vst [vmem:[%s2620_s11 + $0x28] sm:$0xff] (%p2338_p5), %v1817_v10 }
 0x560   : > { %1774 = vst [vmem:[%s2369_s25 + $0xb8] sm:$0xff] %v1744_v62  ;;  %v1693_v63 = vpop.f32.mrf.mxu0  ;;  %1789 = sbr.rel (!%p2338_p5) target bundleno = 1389 (0x56d), region = 56  ;;  %1822 = vst [vmem:[%s2620_s11 + $0x38] sm:$0xff] (%p2338_p5), %v1821_v13  ;;  %v1831_v6 = vld [vmem:[%s2369_s25 + $0x60] sm:$0xff] (%p2338_p5) }
 0x561   : > { %1779 = vst [vmem:[%s2369_s25 + $0xe0] sm:$0x7f] %v1693_v63  ;;  %v1746_v0 = vpop.f32.mrf.mxu1  ;;  %v1835_v18 = vld [vmem:[%s2369_s25 + $0x70] sm:$0xff] (%p2338_p5)  ;;  %1832 = vst [vmem:[%s2620_s11 + $0x120] sm:$0xff] (%p2338_p5), %v1831_v6 }
 0x562   : > { %1781 = vst [vmem:[%s2369_s25 + $0xf0] sm:$0x7f] %v1746_v0  ;;  %v1695_v2 = vpop.f32.mrf.mxu0  ;;  %v1833_v17 = vld [vmem:[%s2369_s25 + $0x68] sm:$0xff] (%p2338_p5)  ;;  %1836 = vst [vmem:[%s2620_s11 + $0x130] sm:$0xff] (%p2338_p5), %v1835_v18 }
 0x563   : > { %1780 = vst [vmem:[%s2369_s25 + $0xe8] sm:$0x7f] %v1695_v2  ;;  %v1748_v3 = vpop.f32.mrf.mxu1  ;;  %1834 = vst [vmem:[%s2620_s11 + $0x128] sm:$0xff] (%p2338_p5), %v1833_v17  ;;  %v1837_v19 = vld [vmem:[%s2369_s25 + $0x78] sm:$0xff] (%p2338_p5) }
 0x564   : > { %1782 = vst [vmem:[%s2369_s25 + $0xf8] sm:$0x7f] %v1748_v3  ;;  %1838 = vst [vmem:[%s2620_s11 + $0x138] sm:$0xff] (%p2338_p5), %v1837_v19  ;;  %v1847_v24 = vld [vmem:[%s2369_s25 + $0xa0] sm:$0xff] (%p2338_p5) }
 0x565   : > { %1848 = vst [vmem:[%s2620_s11 + $0x220] sm:$0xff] %v1847_v24  ;;  %v1851_v26 = vld [vmem:[%s2369_s25 + $0xb0] sm:$0xff] }
 0x566   : > { %v1849_v25 = vld [vmem:[%s2369_s25 + $0xa8] sm:$0xff]  ;;  %1852 = vst [vmem:[%s2620_s11 + $0x230] sm:$0xff] %v1851_v26 }
 0x567   : > { %v1853_v27 = vld [vmem:[%s2369_s25 + $0xb8] sm:$0xff]  ;;  %1850 = vst [vmem:[%s2620_s11 + $0x228] sm:$0xff] %v1849_v25 }
 0x568   : > { %1854 = vst [vmem:[%s2620_s11 + $0x238] sm:$0xff] %v1853_v27  ;;  %v1863_v32 = vld [vmem:[%s2369_s25 + $0xe0] sm:$0xff] }
 0x569   : > { %1864 = vst [vmem:[%s2620_s11 + $0x320] sm:$0xff] %v1863_v32  ;;  %v1867_v34 = vld [vmem:[%s2369_s25 + $0xf0] sm:$0xff] }
 0x56a   : > { %v1865_v33 = vld [vmem:[%s2369_s25 + $0xe8] sm:$0xff]  ;;  %1868 = vst [vmem:[%s2620_s11 + $0x330] sm:$0xff] %v1867_v34 }
 0x56b   : > { %1866 = vst [vmem:[%s2620_s11 + $0x328] sm:$0xff] %v1865_v33  ;;  %v1869_v35 = vld [vmem:[%s2369_s25 + $0xf8] sm:$0xff] }
 0x56c   : > { %1870 = vst [vmem:[%s2620_s11 + $0x338] sm:$0xff] %v1869_v35 }
 0x56d PF: > { %s17_s30 = sadd.s32 1, %s2245_s30   ;;  %s2718_s24 = sld [smem:[#allocation4_spill]] }
 0x56e   : > { %p14_p12 = scmp.ge.s32.totalorder %s17_s30, 10   ;;  %s2719_s25 = sld [smem:[#allocation9_spill]] }
 0x56f   : > { %s2720_s26 = sld [smem:[#allocation5_spill]] }
 0x570   : > { %s2721_s27 = sld [smem:[#allocation6_spill]]  ;;  %16 = sbr.rel (!%p14_p12) target bundleno = 4 (0x4), region = 111 }
 0x571   : > { %s2722_s28 = sld [smem:[#allocation7_spill]] }
 0x572   : > { %s2723_s29 = sld [smem:[#allocation8_spill]] }

</bundles_post_ra>
